<compile_context>
chip_gen: v5e
topology: v5e:2x2
jax: 0.10.0
libtpu: 0.0.40
codegen_flags: <defaults>
</compile_context>

<pallas_src>
import functools

import jax
import jax.numpy as jnp
from jax.experimental import pallas as pl
from jax.experimental.pallas import tpu as pltpu

INPUT_SIZE = 32            # stands in for test_x.shape[1]
H1, H2, H3, OUT = 100, 50, 50, 1

D = 128                    # lane-padded feature width for every layer
NUM_LAYERS = 4
SLAB_ROWS = D + 8          # 128 weight rows + 8 sublane-aligned rows (row D = bias)
NEG_BIG = -1e30            # finite "-inf" for masked softmax lanes


def _round_up(x, m):
    return (x + m - 1) // m * m


def mlp_kernel(x_ref, p_ref, o_ref, *, out_features):
    x = x_ref[...]                                  # (TB, in_dim) f32
    in_dim = x.shape[-1]

    # fc1..fc3 + ReLU.  Padded weight columns / bias lanes are zero, so the
    # padded activation lanes stay exactly 0 through every layer.
    h = x
    for k in range(NUM_LAYERS - 1):
        rows = in_dim if k == 0 else D
        w = p_ref[k, 0:rows, :]                     # (rows, 128)
        b = p_ref[k, D:D + 1, :]                    # (1, 128)
        h = jnp.dot(h, w, preferred_element_type=jnp.float32) + b
        h = jnp.maximum(h, 0.0)

    # fc4 (no activation)
    w4 = p_ref[NUM_LAYERS - 1, 0:D, :]
    b4 = p_ref[NUM_LAYERS - 1, D:D + 1, :]
    logits = jnp.dot(h, w4, preferred_element_type=jnp.float32) + b4  # (TB, 128)

    # log_softmax over dim=1, restricted to the real output columns.
    col = jax.lax.broadcasted_iota(jnp.int32, logits.shape, 1)
    masked = jnp.where(col < out_features, logits, NEG_BIG)
    m = jnp.max(masked, axis=1, keepdims=True)
    z = masked - m
    lse = jnp.log(jnp.sum(jnp.exp(z), axis=1, keepdims=True))
    o_ref[...] = (z - lse).astype(o_ref.dtype)      # lane-dense (TB, 128) store


def pack_params(params):
    """One-time packing: transpose + zero-pad into a single (4, 136, 128) slab."""
    slabs = []
    for w, b in params:
        out_f, in_f = w.shape
        assert in_f <= D and out_f <= D, "feature dim exceeds padded width D"
        wt = jnp.zeros((D, D), jnp.float32).at[:in_f, :out_f].set(
            w.T.astype(jnp.float32))
        bb = jnp.zeros((8, D), jnp.float32).at[0, :out_f].set(
            b.astype(jnp.float32))
        slabs.append(jnp.concatenate([wt, bb], axis=0))    # (136, 128)
    return jnp.stack(slabs)                                # (4, 136, 128)


def net_forward(x, packed, out_features=OUT):
    B, in_dim = x.shape
    x = x.astype(jnp.float32)

    # Batch tiling: tile is a multiple of 8 sublanes, capped at 512 rows so the
    # resident bytes stay far under v7x's 64 MiB VMEM.
    MAX_TB = 512
    b_pad = _round_up(B, 8)
    tb = b_pad if b_pad <= MAX_TB else MAX_TB
    b_pad = _round_up(b_pad, tb)
    if b_pad != B:
        x = jnp.pad(x, ((0, b_pad - B), (0, 0)))

    out = pl.pallas_call(
        functools.partial(mlp_kernel, out_features=out_features),
        out_shape=jax.ShapeDtypeStruct((b_pad, D), jnp.float32),
        grid=(b_pad // tb,),
        in_specs=[
            pl.BlockSpec((tb, in_dim), lambda i: (i, 0)),
            # Same block every step -> weights stay VMEM-resident.
            pl.BlockSpec((NUM_LAYERS, SLAB_ROWS, D), lambda i: (0, 0, 0)),
        ],
        out_specs=pl.BlockSpec((tb, D), lambda i: (i, 0)),
        compiler_params=pltpu.CompilerParams(
            dimension_semantics=("parallel",)),
    )(x, packed)

    return out[:B, :out_features]


def init_params(key):
    # Deterministic init mimicking torch.nn.Linear default (uniform +/- 1/sqrt(fan_in)).
    def linear(k, out_f, in_f):
        kw, kb = jax.random.split(k)
        bound = 1.0 / jnp.sqrt(in_f)
        w = jax.random.uniform(kw, (out_f, in_f), jnp.float32, -bound, bound)
        b = jax.random.uniform(kb, (out_f,), jnp.float32, -bound, bound)
        return w, b

    k1, k2, k3, k4 = jax.random.split(key, 4)
    return (linear(k1, H1, INPUT_SIZE),
            linear(k2, H2, H1),
            linear(k3, H3, H2),
            linear(k4, OUT, H3))


def reference_forward(x, params):
    (w1, b1), (w2, b2), (w3, b3), (w4, b4) = params
    h = jnp.maximum(x @ w1.T + b1, 0.0)
    h = jnp.maximum(h @ w2.T + b2, 0.0)
    h = jnp.maximum(h @ w3.T + b3, 0.0)
    logits = h @ w4.T + b4
    return jax.nn.log_softmax(logits, axis=1)


if __name__ == "__main__":
    key = jax.random.PRNGKey(0)
    kx, kp = jax.random.split(key)
    B = 8
    x = jax.random.normal(kx, (B, INPUT_SIZE), jnp.float32)
    params = init_params(kp)

    packed = pack_params(params)          # one-time packing (not per forward)
    out = net_forward(x, packed)
    out = jax.block_until_ready(out)

    ref = reference_forward(x, params)
    assert out.shape == (B, OUT)
    assert jnp.allclose(out, ref, atol=1e-5, rtol=1e-5)
    assert bool(jnp.all(jnp.isfinite(out)))

    print("KERNEL_OK")
</pallas_src>

<mosaic_0001>
module attributes {stable_mosaic.version = 11 : i64} {
  func.func @mlp_kernel(%arg0: i32, %arg1: memref<8x32xf32, #tpu.memory_space<vmem>>, %arg2: memref<4x136x128xf32, #tpu.memory_space<vmem>>, %arg3: memref<8x128xf32, #tpu.memory_space<vmem>>) attributes {dimension_semantics = [#tpu.dimension_semantics<parallel>], iteration_bounds = array<i64: 1>, scalar_prefetch = 0 : i64, scratch_operands = 0 : i64, tpu.core_type = #tpu.core_type<tc>, window_params = [{transform_indices = @transform_0, window_bounds = array<i64: 8, 32>}, {pipeline_mode = #tpu.pipeline_mode<synchronous>, transform_indices = @transform_1, window_bounds = array<i64: 4, 136, 128>}, {transform_indices = @transform_2, window_bounds = array<i64: 8, 128>}]} {
    %c0 = arith.constant 0 : index
    %c0_0 = arith.constant 0 : index
    %0 = vector.load %arg1[%c0, %c0_0] : memref<8x32xf32, #tpu.memory_space<vmem>>, vector<8x32xf32>
    %c0_1 = arith.constant 0 : index
    %c0_2 = arith.constant 0 : index
    %c0_3 = arith.constant 0 : index
    %1 = vector.load %arg2[%c0_1, %c0_2, %c0_3] : memref<4x136x128xf32, #tpu.memory_space<vmem>>, vector<1x32x128xf32>
    %2 = vector.shape_cast %1 : vector<1x32x128xf32> to vector<32x128xf32>
    %c0_4 = arith.constant 0 : index
    %c128 = arith.constant 128 : index
    %c0_5 = arith.constant 0 : index
    %3 = vector.load %arg2[%c0_4, %c128, %c0_5] : memref<4x136x128xf32, #tpu.memory_space<vmem>>, vector<1x1x128xf32>
    %4 = vector.shape_cast %3 : vector<1x1x128xf32> to vector<1x128xf32>
    %cst = arith.constant dense<0.000000e+00> : vector<8x128xf32>
    %5 = tpu.matmul %0, %2, %cst {dimension_numbers = #tpu.dot_dimension_numbers<[1], [0], [0], [1], [0, 0, 1, 1], [], []>} : vector<8x32xf32>, vector<32x128xf32>, vector<8x128xf32> -> vector<8x128xf32>
    %6 = vector.broadcast %4 : vector<1x128xf32> to vector<8x128xf32>
    %7 = arith.addf %5, %6 : vector<8x128xf32>
    %cst_6 = arith.constant 0.000000e+00 : f32
    %8 = vector.broadcast %cst_6 : f32 to vector<8x128xf32>
    %9 = arith.maximumf %7, %8 : vector<8x128xf32>
    %c1 = arith.constant 1 : index
    %c0_7 = arith.constant 0 : index
    %c0_8 = arith.constant 0 : index
    %10 = vector.load %arg2[%c1, %c0_7, %c0_8] : memref<4x136x128xf32, #tpu.memory_space<vmem>>, vector<1x128x128xf32>
    %11 = vector.shape_cast %10 : vector<1x128x128xf32> to vector<128x128xf32>
    %c1_9 = arith.constant 1 : index
    %c128_10 = arith.constant 128 : index
    %c0_11 = arith.constant 0 : index
    %12 = vector.load %arg2[%c1_9, %c128_10, %c0_11] : memref<4x136x128xf32, #tpu.memory_space<vmem>>, vector<1x1x128xf32>
    %13 = vector.shape_cast %12 : vector<1x1x128xf32> to vector<1x128xf32>
    %cst_12 = arith.constant dense<0.000000e+00> : vector<8x128xf32>
    %14 = tpu.matmul %9, %11, %cst_12 {dimension_numbers = #tpu.dot_dimension_numbers<[1], [0], [0], [1], [0, 0, 1, 1], [], []>} : vector<8x128xf32>, vector<128x128xf32>, vector<8x128xf32> -> vector<8x128xf32>
    %15 = vector.broadcast %13 : vector<1x128xf32> to vector<8x128xf32>
    %16 = arith.addf %14, %15 : vector<8x128xf32>
    %cst_13 = arith.constant 0.000000e+00 : f32
    %17 = vector.broadcast %cst_13 : f32 to vector<8x128xf32>
    %18 = arith.maximumf %16, %17 : vector<8x128xf32>
    %c2 = arith.constant 2 : index
    %c0_14 = arith.constant 0 : index
    %c0_15 = arith.constant 0 : index
    %19 = vector.load %arg2[%c2, %c0_14, %c0_15] : memref<4x136x128xf32, #tpu.memory_space<vmem>>, vector<1x128x128xf32>
    %20 = vector.shape_cast %19 : vector<1x128x128xf32> to vector<128x128xf32>
    %c2_16 = arith.constant 2 : index
    %c128_17 = arith.constant 128 : index
    %c0_18 = arith.constant 0 : index
    %21 = vector.load %arg2[%c2_16, %c128_17, %c0_18] : memref<4x136x128xf32, #tpu.memory_space<vmem>>, vector<1x1x128xf32>
    %22 = vector.shape_cast %21 : vector<1x1x128xf32> to vector<1x128xf32>
    %cst_19 = arith.constant dense<0.000000e+00> : vector<8x128xf32>
    %23 = tpu.matmul %18, %20, %cst_19 {dimension_numbers = #tpu.dot_dimension_numbers<[1], [0], [0], [1], [0, 0, 1, 1], [], []>} : vector<8x128xf32>, vector<128x128xf32>, vector<8x128xf32> -> vector<8x128xf32>
    %24 = vector.broadcast %22 : vector<1x128xf32> to vector<8x128xf32>
    %25 = arith.addf %23, %24 : vector<8x128xf32>
    %cst_20 = arith.constant 0.000000e+00 : f32
    %26 = vector.broadcast %cst_20 : f32 to vector<8x128xf32>
    %27 = arith.maximumf %25, %26 : vector<8x128xf32>
    %c3 = arith.constant 3 : index
    %c0_21 = arith.constant 0 : index
    %c0_22 = arith.constant 0 : index
    %28 = vector.load %arg2[%c3, %c0_21, %c0_22] : memref<4x136x128xf32, #tpu.memory_space<vmem>>, vector<1x128x128xf32>
    %29 = vector.shape_cast %28 : vector<1x128x128xf32> to vector<128x128xf32>
    %c3_23 = arith.constant 3 : index
    %c128_24 = arith.constant 128 : index
    %c0_25 = arith.constant 0 : index
    %30 = vector.load %arg2[%c3_23, %c128_24, %c0_25] : memref<4x136x128xf32, #tpu.memory_space<vmem>>, vector<1x1x128xf32>
    %31 = vector.shape_cast %30 : vector<1x1x128xf32> to vector<1x128xf32>
    %cst_26 = arith.constant dense<0.000000e+00> : vector<8x128xf32>
    %32 = tpu.matmul %27, %29, %cst_26 {dimension_numbers = #tpu.dot_dimension_numbers<[1], [0], [0], [1], [0, 0, 1, 1], [], []>} : vector<8x128xf32>, vector<128x128xf32>, vector<8x128xf32> -> vector<8x128xf32>
    %33 = vector.broadcast %31 : vector<1x128xf32> to vector<8x128xf32>
    %34 = arith.addf %32, %33 : vector<8x128xf32>
    %35 = tpu.iota {dimensions = array<i32: 1>} : vector<8x128xi32>
    %c1_i32 = arith.constant 1 : i32
    %36 = vector.broadcast %c1_i32 : i32 to vector<8x128xi32>
    %37 = arith.cmpi slt, %35, %36 : vector<8x128xi32>
    %cst_27 = arith.constant -1.000000e+30 : f32
    %38 = vector.broadcast %cst_27 : f32 to vector<8x128xf32>
    %39 = arith.select %37, %34, %38 : vector<8x128xi1>, vector<8x128xf32>
    %cst_28 = arith.constant dense<0xFF800000> : vector<8xf32>
    %40 = vector.multi_reduction <maximumf>, %39, %cst_28 [1] : vector<8x128xf32> to vector<8xf32>
    %41 = vector.shape_cast %40 : vector<8xf32> to vector<8x1xf32>
    %42 = vector.broadcast %41 : vector<8x1xf32> to vector<8x128xf32>
    %43 = arith.subf %39, %42 : vector<8x128xf32>
    %44 = math.exp %43 : vector<8x128xf32>
    %cst_29 = arith.constant dense<0.000000e+00> : vector<8xf32>
    %45 = vector.multi_reduction <add>, %44, %cst_29 [1] : vector<8x128xf32> to vector<8xf32>
    %46 = vector.shape_cast %45 : vector<8xf32> to vector<8x1xf32>
    %47 = math.log %46 : vector<8x1xf32>
    %48 = vector.broadcast %47 : vector<8x1xf32> to vector<8x128xf32>
    %49 = arith.subf %43, %48 : vector<8x128xf32>
    %c0_30 = arith.constant 0 : index
    %c0_31 = arith.constant 0 : index
    %50 = vector.load %arg3[%c0_30, %c0_31] : memref<8x128xf32, #tpu.memory_space<vmem>>, vector<8x128xf32>
    tpu.vector_store %arg3[%c0_30, %c0_31], %49 {strides = array<i32>} : memref<8x128xf32, #tpu.memory_space<vmem>>, vector<8x128xf32>,
    return
  }
  func.func @transform_0(%arg0: i32) -> (i32, i32) {
    %c0_i32 = arith.constant 0 : i32
    %c0_i32_0 = arith.constant 0 : i32
    return %arg0, %c0_i32 : i32, i32
  }
  func.func @transform_1(%arg0: i32) -> (i32, i32, i32) {
    %c0_i32 = arith.constant 0 : i32
    %c0_i32_0 = arith.constant 0 : i32
    %c0_i32_1 = arith.constant 0 : i32
    %c0_i32_2 = arith.constant 0 : i32
    return %c0_i32, %c0_i32_0, %c0_i32_1 : i32, i32, i32
  }
  func.func @transform_2(%arg0: i32) -> (i32, i32) {
    %c0_i32 = arith.constant 0 : i32
    %c0_i32_0 = arith.constant 0 : i32
    return %arg0, %c0_i32 : i32, i32
  }
}

</mosaic_0001>

<bundles_post_ra>
// kernel: tpu_custom_call.1
= control target key start
LH: loop header
LB: loop body
LE: loop exit
PB: predicated region body
PF: predicated region fallthrough
CT: control target
= control target key end

     0   :  { %7 = vsyncpa [#allocation3], 0  ;;  %s347_s0 = inlined_call_operand.hbm [shape: f32[8,32], index: 0, kind: input, shape index: {}]   ;;  %s348_s1 = inlined_call_operand.hbm [shape: f32[4,136,128], index: 1, kind: input, shape index: {}]   ;;  %s349_s2 = inlined_call_operand.hbm [shape: f32[8,128], index: 2, kind: output, shape index: {}]  }
   0x1   :  { %8 = vsyncpa [#allocation6], 0 }
   0x2   :  { %9 = vsyncpa [#allocation4], 0  ;;  %s15_s11 = sshll.u32 %s347_s0, 4  ;;  %s318_s12 = smov [#allocation2]   ;;  %s16_s11 = int_to_ptr.hbm [resolvable:$true] %s15_s11 }
   0x3   :  { %s17_s13 = sshll.u32 %s318_s12, 4  ;;  %s25_s16 = sshll.u32 %s348_s1, 4  ;;  %s18_s13 = int_to_ptr.vmem [resolvable:$true] %s17_s13  ;;  %s26_s16 = int_to_ptr.hbm [resolvable:$true] %s25_s16 }
   0x4   :  { %20 = dma.hbm_to_vmem [thread:$0]  %s16_s11, 128, %s18_s13, [#allocation3]  }
   0x5   :  { %s319_s17 = smov [#allocation5]   ;;  %s320_s19 = smov 128  }
   0x6   :  { %s27_s18 = sshll.u32 %s319_s17, 4  ;;  %s321_s20 = smov 8   ;;  %s28_s18 = int_to_ptr.vmem [resolvable:$true] %s27_s18 }
   0x7   :  { %33 = dma.hbm_to_vmem [thread:$0]  %s26_s16, 8704, %s28_s18, [#allocation6], %s320_s19, %s320_s19, %s321_s20  }
   0x8   :  { %312 = dma.done.wait [#allocation3], 128  }
   0x9   :  { %313 = vsyncadd [#allocation3], 4294967168 }
   0xa   :  { %314 = dma.done.wait [#allocation6], 8704  }
   0xb   :  { %315 = vsyncadd [#allocation6], 4294958592  ;;  %v46_v0 = vld [vmem:[#allocation5 + $0x18] sm:$0xff]  ;;  %v45_v1 = vld [vmem:[#allocation5 + $0x10] sm:$0xff]  ;;  %vm49_vm0 = vcmask 261120   ;;  %s322_s0 = smov [#allocation7]  }
   0xc   :  { %65 = vmatpush.msra.mxu0 %v46_v0  ;;  %v90_v2 = vld [vmem:[#allocation5 + $0x100] sm:$0xff]  ;;  %v44_v3 = vld [vmem:[#allocation5 + $0x8] sm:$0xff]  ;;  %v89_v4 = vld [vmem:[#allocation5 + $0xf8] sm:$0xff]  ;;  %s213_s1 = sshll.u32 %s322_s0, 4  ;;  %s215_s23 = sshll.u32 %s349_s2, 4  ;;  %s214_s1 = int_to_ptr.vmem [resolvable:$true] %s213_s1  ;;  %s216_s23 = int_to_ptr.hbm [resolvable:$true] %s215_s23 }
   0xd   :  { %93 = vmatpush.msra.mxu1 %v90_v2  ;;  %v88_v5 = vld [vmem:[#allocation5 + $0xf0] sm:$0xff]  ;;  %v43_v6 = vld [vmem:[#allocation5] sm:$0xff]  ;;  %v42_v7 = vld [vmem:[#allocation2] sm:$0xff] }
   0xe   :  { %66 = vmatpush.msra.mxu0 %v45_v1  ;;  %v87_v8 = vld [vmem:[#allocation5 + $0xe8] sm:$0xff]  ;;  %v86_v9 = vld [vmem:[#allocation5 + $0xe0] sm:$0xff]  ;;  %v85_v10 = vld [vmem:[#allocation5 + $0xd8] sm:$0xff]  ;;  %v193_v1 = vlaneseq }
   0xf   :  { %94 = vmatpush.msra.mxu1 %v89_v4  ;;  %v84_v11 = vld [vmem:[#allocation5 + $0xd0] sm:$0xff]  ;;  %v83_v12 = vld [vmem:[#allocation5 + $0xc8] sm:$0xff]  ;;  %v82_v13 = vld [vmem:[#allocation5 + $0xc0] sm:$0xff] }
  0x10   :  { %67 = vmatpush.msra.mxu0 %v44_v3  ;;  %v81_v14 = vld [vmem:[#allocation5 + $0xb8] sm:$0xff]  ;;  %v80_v15 = vld [vmem:[#allocation5 + $0xb0] sm:$0xff]  ;;  %v79_v16 = vld [vmem:[#allocation5 + $0xa8] sm:$0xff]  ;;  %v194_v2 = vand.u32 127, %v193_v1 }
  0x11   :  { %95 = vmatpush.msra.mxu1 %v88_v5  ;;  %v78_v17 = vld [vmem:[#allocation5 + $0xa0] sm:$0xff]  ;;  %v77_v18 = vld [vmem:[#allocation5 + $0x98] sm:$0xff]  ;;  %v76_v19 = vld [vmem:[#allocation5 + $0x90] sm:$0xff] }
  0x12   :  { %68 = vmatpush.msra.mxu0 %v43_v6  ;;  %v75_v20 = vld [vmem:[#allocation5 + $0x88] sm:$0xff]  ;;  %v129_v22 = vld [vmem:[#allocation5 + $0x180] sm:$0xff]  ;;  %v128_v23 = vld [vmem:[#allocation5 + $0x178] sm:$0xff]  ;;  %vm195_vm1 = vcmp.lt.s32.totalorder %v194_v2, 1 }
  0x13   :  { %226 = vmatmul.msk.f32.vlgmr.msra.gmra.mxu0 %vm49_vm0, %v42_v7  ;;  %96 = vmatpush.msra.mxu1 %v87_v8  ;;  %v130_v21 = vld [vmem:[#allocation5 + $0x188] sm:$0xff]  ;;  %v127_v24 = vld [vmem:[#allocation5 + $0x170] sm:$0xff]  ;;  %v125_v26 = vld [vmem:[#allocation5 + $0x160] sm:$0xff] }
  0x14   :  { %133 = vmatpush.msra.mxu2 %v130_v21  ;;  %v126_v25 = vld [vmem:[#allocation5 + $0x168] sm:$0xff]  ;;  %v124_v27 = vld [vmem:[#allocation5 + $0x158] sm:$0xff]  ;;  %v123_v28 = vld [vmem:[#allocation5 + $0x150] sm:$0xff] }
  0x15   :  { %97 = vmatpush.msra.mxu1 %v86_v9  ;;  %v122_v29 = vld [vmem:[#allocation5 + $0x148] sm:$0xff]  ;;  %v121_v30 = vld [vmem:[#allocation5 + $0x140] sm:$0xff]  ;;  %v120_v31 = vld [vmem:[#allocation5 + $0x138] sm:$0xff] }
  0x16   :  { %134 = vmatpush.msra.mxu2 %v129_v22  ;;  %v119_v32 = vld [vmem:[#allocation5 + $0x130] sm:$0xff]  ;;  %v118_v33 = vld [vmem:[#allocation5 + $0x128] sm:$0xff]  ;;  %v232_v34 = vld [vmem:[#allocation5 + $0x80] ss:$0 sm:$0xff] }
  0x17   :  { %98 = vmatpush.msra.mxu1 %v85_v10  ;;  %v117_v38 = vld [vmem:[#allocation5 + $0x120] sm:$0xff]  ;;  %v116_v39 = vld [vmem:[#allocation5 + $0x118] sm:$0xff]  ;;  %v115_v40 = vld [vmem:[#allocation5 + $0x110] sm:$0xff] }
  0x18   :  { %135 = vmatpush.msra.mxu2 %v128_v23  ;;  %v170_v41 = vld [vmem:[#allocation5 + $0x210] sm:$0xff]  ;;  %v169_v42 = vld [vmem:[#allocation5 + $0x208] sm:$0xff]  ;;  %v168_v43 = vld [vmem:[#allocation5 + $0x200] sm:$0xff] }
  0x19   :  { %99 = vmatpush.msra.mxu1 %v84_v11  ;;  %173 = vmatpush.msra.mxu3 %v170_v41  ;;  %v167_v44 = vld [vmem:[#allocation5 + $0x1f8] sm:$0xff]  ;;  %v166_v45 = vld [vmem:[#allocation5 + $0x1f0] sm:$0xff]  ;;  %v165_v46 = vld [vmem:[#allocation5 + $0x1e8] sm:$0xff] }
  0x1a   :  { %136 = vmatpush.msra.mxu2 %v127_v24  ;;  %v164_v47 = vld [vmem:[#allocation5 + $0x1e0] sm:$0xff]  ;;  %v163_v48 = vld [vmem:[#allocation5 + $0x1d8] sm:$0xff]  ;;  %v162_v49 = vld [vmem:[#allocation5 + $0x1d0] sm:$0xff] }
  0x1b   :  { %100 = vmatpush.msra.mxu1 %v83_v12  ;;  %174 = vmatpush.msra.mxu3 %v169_v42  ;;  %v161_v50 = vld [vmem:[#allocation5 + $0x1c8] sm:$0xff]  ;;  %v160_v51 = vld [vmem:[#allocation5 + $0x1c0] sm:$0xff]  ;;  %v159_v52 = vld [vmem:[#allocation5 + $0x1b8] sm:$0xff] }
  0x1c   :  { %137 = vmatpush.msra.mxu2 %v126_v25  ;;  %v158_v53 = vld [vmem:[#allocation5 + $0x1b0] sm:$0xff]  ;;  %v233_v54 = vld [vmem:[#allocation5 + $0x108] ss:$0 sm:$0xff]  ;;  %v156_v59 = vld [vmem:[#allocation5 + $0x1a0] sm:$0xff] }
  0x1d   :  { %101 = vmatpush.msra.mxu1 %v82_v13  ;;  %175 = vmatpush.msra.mxu3 %v168_v43  ;;  %v157_v58 = vld [vmem:[#allocation5 + $0x1a8] sm:$0xff]  ;;  %v155_v60 = vld [vmem:[#allocation5 + $0x198] sm:$0xff]  ;;  %v234_v61 = vld [vmem:[#allocation5 + $0x190] ss:$0 sm:$0xff] }
  0x1e   :  { %138 = vmatpush.msra.mxu2 %v125_v26  ;;  %v235_v3 = vld [vmem:[#allocation5 + $0x218] ss:$0 sm:$0xff] }
  0x1f   :  { %102 = vmatpush.msra.mxu1 %v81_v14  ;;  %176 = vmatpush.msra.mxu3 %v167_v44 }
  0x20   :  { %139 = vmatpush.msra.mxu2 %v124_v27 }
  0x21   :  { %103 = vmatpush.msra.mxu1 %v80_v15  ;;  %177 = vmatpush.msra.mxu3 %v166_v45 }
  0x22   :  { %140 = vmatpush.msra.mxu2 %v123_v28 }
  0x23   :  { %104 = vmatpush.msra.mxu1 %v79_v16  ;;  %178 = vmatpush.msra.mxu3 %v165_v46 }
  0x24   :  { %141 = vmatpush.msra.mxu2 %v122_v29 }
  0x25   :  { %105 = vmatpush.msra.mxu1 %v78_v17  ;;  %179 = vmatpush.msra.mxu3 %v164_v47 }
  0x26   :  { %142 = vmatpush.msra.mxu2 %v121_v30 }
  0x27   :  { %106 = vmatpush.msra.mxu1 %v77_v18  ;;  %180 = vmatpush.msra.mxu3 %v163_v48 }
  0x28   :  { %143 = vmatpush.msra.mxu2 %v120_v31 }
  0x29   :  { %107 = vmatpush.msra.mxu1 %v76_v19  ;;  %181 = vmatpush.msra.mxu3 %v162_v49 }
  0x2a   :  { %144 = vmatpush.msra.mxu2 %v119_v32 }
  0x2b   :  { %108 = vmatpush.msra.mxu1 %v75_v20  ;;  %182 = vmatpush.msra.mxu3 %v161_v50 }
  0x2c   :  { %145 = vmatpush.msra.mxu2 %v118_v33 }
  0x2d   :  { %183 = vmatpush.msra.mxu3 %v160_v51 }
  0x2e   :  { %146 = vmatpush.msra.mxu2 %v117_v38 }
  0x2f   :  { %184 = vmatpush.msra.mxu3 %v159_v52 }
  0x30   :  { %147 = vmatpush.msra.mxu2 %v116_v39 }
  0x31   :  { %185 = vmatpush.msra.mxu3 %v158_v53 }
  0x32   :  { %148 = vmatpush.msra.mxu2 %v115_v40 }
  0x33   :  { %186 = vmatpush.msra.mxu3 %v157_v58 }
  0x35   :  { %187 = vmatpush.msra.mxu3 %v156_v59 }
  0x37   :  { %188 = vmatpush.msra.mxu3 %v155_v60 }
  0x90   :  { %v70_v35 = vpop.f32.mrf.mxu0 }
  0x91   :  { %v71_v36 = vadd.f32 %v232_v34, %v70_v35 }
  0x93   :  { %v73_v37 = vmax.f32 %v71_v36, 0.0 }
  0x95   :  { %109 = vmatmul.f32.vlgmr.msra.gmra.mxu1 %v73_v37 }
 0x112   :  { %v110_v55 = vpop.f32.mrf.mxu1 }
 0x113   :  { %v111_v56 = vadd.f32 %v233_v54, %v110_v55 }
 0x115   :  { %v113_v57 = vmax.f32 %v111_v56, 0.0 }
 0x117   :  { %149 = vmatmul.f32.vlgmr.msra.gmra.mxu2 %v113_v57 }
 0x19a   :  { %v150_v62 = vpop.f32.mrf.mxu2 }
 0x19b   :  { %v151_v63 = vadd.f32 %v234_v61, %v150_v62 }
 0x19d   :  { %v153_v0 = vmax.f32 %v151_v63, 0.0 }
 0x19f   :  { %189 = vmatmul.f32.vlgmr.msra.gmra.mxu3 %v153_v0 }
 0x222   :  { %v190_v4 = vpop.f32.mrf.mxu3 }
 0x223   :  { %v191_v5 = vadd.f32 %v235_v3, %v190_v4 }
 0x225   :  { %v196_v6 = vsel %vm195_vm1, %v191_v5, -1e+30 }
 0x226   :  { %197 = vmax.xlane.f32.xlu0 %v196_v6 }
 0x299   :  { %v198_v7 = vpop.xlane.xlu0 %197 }
 0x29a   :  { %v199_v8 = vsub.f32 %v196_v6, %v198_v7 }
 0x29c   :  { %v200_v9 = vmul.f32 1.442695, %v199_v8 }
 0x29e   :  { %236 = vpow2.f32 %v200_v9 }
 0x2a4   :  { %v237_v10 = vpop.eup %236 }
 0x2a5   :  { %202 = vadd.xlane.f32.xlu0 %v237_v10 }
 0x318   :  { %v203_v11 = vpop.xlane.xlu0 %202 }
 0x319   :  { %238 = vlog2.f32 %v203_v11 }
 0x31f   :  { %v239_v12 = vpop.eup %238 }
 0x320   :  { %v205_v13 = vmul.f32 0.6931472, %v239_v12 }
 0x322   :  { %v206_v14 = vsub.f32 %v199_v8, %v205_v13 }
 0x324   :  { %207 = vst [vmem:[#allocation7] sm:$0xff] %v206_v14 }
 0x325   :  { %218 = dma.vmem_to_hbm [thread:$0]  %s214_s1, 128, %s216_s23, [#allocation4]  }
 0x326   :  { %316 = dma.done.wait [#allocation4], 128  }
 0x327   :  { %317 = vsyncadd [#allocation4], 4294967168 }
 0x328   :  { %223 = vsyncpa [#allocation3], 1 }
 0x329   :  { %224 = vsyncpa [#allocation6], 1 }
 0x32a   :  { %225 = vsyncpa [#allocation4], 1 }

</bundles_post_ra>
